<compile_context>
chip_gen: v5e
topology: v5e:2x2
jax: 0.10.0
libtpu: 0.0.40
codegen_flags: <defaults>
</compile_context>

<pallas_src>
import functools

import jax
import jax.numpy as jnp
from jax import lax
from jax.experimental import pallas as pl
from jax.experimental.pallas import tpu as pltpu


def _round_up(x, m):
    return ((x + m - 1) // m) * m


# ---------------------------------------------------------------------------
# Kernels
# ---------------------------------------------------------------------------
def _noisy_linear_train_kernel(x_ref, wmu_ref, wsig_ref, eout_ref, ein_ref,
                               bmu_ref, bsig_ref, beps_ref, o_ref, acc_ref,
                               *, min_sigma, compute_dtype):
    k = pl.program_id(2)

    @pl.when(k == 0)
    def _():
        acc_ref[...] = jnp.zeros_like(acc_ref)

    # Clamp sigma and rebuild the rank-1 factorized noise in-kernel
    # (no dense (out, in) epsilon array ever touches HBM).
    w_sigma = jnp.maximum(wsig_ref[...], min_sigma)        # (tn, tk)
    w_eps = eout_ref[...] * ein_ref[...]                   # (tn,1)*(1,tk) -> (tn,tk)
    weight = wmu_ref[...] + w_sigma * w_eps                # (tn, tk)

    # x @ weight.T expressed directly as a contraction over the 'in' axis:
    # no transposed weight tile is materialized.
    acc_ref[...] += lax.dot_general(
        x_ref[...].astype(compute_dtype),
        weight.astype(compute_dtype),
        dimension_numbers=(((1,), (1,)), ((), ())),
        preferred_element_type=jnp.float32)

    @pl.when(k == pl.num_programs(2) - 1)
    def _():
        b_sigma = jnp.maximum(bsig_ref[...], min_sigma)    # (1, tn)
        bias = bmu_ref[...] + b_sigma * beps_ref[...]      # (1, tn)
        o_ref[...] = (acc_ref[...] + bias).astype(o_ref.dtype)


def _noisy_linear_eval_kernel(x_ref, wmu_ref, bmu_ref, o_ref, acc_ref,
                              *, compute_dtype):
    k = pl.program_id(2)

    @pl.when(k == 0)
    def _():
        acc_ref[...] = jnp.zeros_like(acc_ref)

    acc_ref[...] += lax.dot_general(
        x_ref[...].astype(compute_dtype),
        wmu_ref[...].astype(compute_dtype),
        dimension_numbers=(((1,), (1,)), ((), ())),
        preferred_element_type=jnp.float32)

    @pl.when(k == pl.num_programs(2) - 1)
    def _():
        o_ref[...] = (acc_ref[...] + bmu_ref[...]).astype(o_ref.dtype)


# ---------------------------------------------------------------------------
# Wrapper
# ---------------------------------------------------------------------------
def noisy_linear_forward(x, weight_mu, weight_sigma, bias_mu, bias_sigma,
                         eps_in, eps_out, *, min_sigma=1e-3, training=True,
                         compute_dtype=jnp.float32,
                         tb_max=256, tn_max=256, tk_max=512):
    """Pallas-backed NoisyLinear forward.

    x:             (..., in_features) float32
    weight_mu/sigma: (out_features, in_features) float32
    bias_mu/sigma:   (out_features,) float32
    eps_in:          (in_features,)  factorized noise (weight_eps = eps_out ⊗ eps_in)
    eps_out:         (out_features,) factorized noise (bias_eps = eps_out)
    compute_dtype:   jnp.float32 or jnp.bfloat16 for the MXU operands
                     (accumulation is always f32).
    """
    orig_shape = x.shape
    in_f = orig_shape[-1]
    x2 = x.reshape(-1, in_f)
    B = x2.shape[0]
    out_f = weight_mu.shape[0]

    # Tile sizes: lane-dense (multiples of 128) on out/in, multiple of 8 on B.
    # Budget sized for v7x's smaller scoped VMEM; fine on v5e/v6e too.
    tb = min(tb_max, _round_up(B, 8))
    tk = min(tk_max, _round_up(in_f, 128))
    tn = min(tn_max, _round_up(out_f, 128))
    B_p = _round_up(B, tb)
    K_p = _round_up(in_f, tk)
    N_p = _round_up(out_f, tn)

    f32 = jnp.float32
    xp = jnp.zeros((B_p, K_p), f32).at[:B, :in_f].set(x2.astype(f32))
    wmu = jnp.zeros((N_p, K_p), f32).at[:out_f, :in_f].set(weight_mu.astype(f32))
    bmu = jnp.zeros((1, N_p), f32).at[0, :out_f].set(bias_mu.astype(f32))

    grid = (B_p // tb, N_p // tn, K_p // tk)
    x_spec = pl.BlockSpec((tb, tk), lambda i, j, k: (i, k))
    w_spec = pl.BlockSpec((tn, tk), lambda i, j, k: (j, k))
    brow_spec = pl.BlockSpec((1, tn), lambda i, j, k: (0, j))
    out_spec = pl.BlockSpec((tb, tn), lambda i, j, k: (i, j))

    compiler_params = pltpu.CompilerParams(
        dimension_semantics=("parallel", "parallel", "arbitrary"),
        vmem_limit_bytes=32 * 1024 * 1024)
    scratch_shapes = [pltpu.VMEM((tb, tn), jnp.float32)]
    out_shape = jax.ShapeDtypeStruct((B_p, N_p), f32)

    if training:
        wsig = jnp.zeros((N_p, K_p), f32).at[:out_f, :in_f].set(
            weight_sigma.astype(f32))
        bsig = jnp.zeros((1, N_p), f32).at[0, :out_f].set(bias_sigma.astype(f32))
        eout_col = jnp.zeros((N_p, 1), f32).at[:out_f, 0].set(eps_out.astype(f32))
        ein_row = jnp.zeros((1, K_p), f32).at[0, :in_f].set(eps_in.astype(f32))
        beps = jnp.zeros((1, N_p), f32).at[0, :out_f].set(eps_out.astype(f32))

        kernel = functools.partial(_noisy_linear_train_kernel,
                                   min_sigma=float(min_sigma),
                                   compute_dtype=compute_dtype)
        yp = pl.pallas_call(
            kernel,
            out_shape=out_shape,
            grid=grid,
            in_specs=[x_spec, w_spec, w_spec,
                      pl.BlockSpec((tn, 1), lambda i, j, k: (j, 0)),
                      pl.BlockSpec((1, tk), lambda i, j, k: (0, k)),
                      brow_spec, brow_spec, brow_spec],
            out_specs=out_spec,
            scratch_shapes=scratch_shapes,
            compiler_params=compiler_params,
        )(xp, wmu, wsig, eout_col, ein_row, bmu, bsig, beps)
    else:
        # Eval fast path: only mu parameters are streamed through VMEM.
        kernel = functools.partial(_noisy_linear_eval_kernel,
                                   compute_dtype=compute_dtype)
        yp = pl.pallas_call(
            kernel,
            out_shape=out_shape,
            grid=grid,
            in_specs=[x_spec, w_spec, brow_spec],
            out_specs=out_spec,
            scratch_shapes=scratch_shapes,
            compiler_params=compiler_params,
        )(xp, wmu, bmu)

    # TODO(synk): for a further HBM-bandwidth win on v6e/v7x, store the mu/sigma
    # parameters in bf16 in HBM (halves the dominant weight read).
    y = yp[:B, :out_f]
    return y.reshape(orig_shape[:-1] + (out_f,))


# ---------------------------------------------------------------------------
# Deterministic parameter / noise construction (mirrors __init__ / reset_*).
# ---------------------------------------------------------------------------
def _scale_noise(key, size):
    v = jax.random.normal(key, (size,), dtype=jnp.float32)
    return jnp.sign(v) * jnp.sqrt(jnp.abs(v))


def make_noisy_linear_params(key, in_features, out_features, std_init=0.5):
    k_wmu, k_bmu, k_ein, k_eout = jax.random.split(key, 4)
    mu_range = 3.0 / (in_features ** 0.5)

    weight_mu = jax.random.uniform(k_wmu, (out_features, in_features),
                                   minval=-mu_range, maxval=mu_range,
                                   dtype=jnp.float32)
    bias_mu = jax.random.uniform(k_bmu, (out_features,),
                                 minval=-mu_range, maxval=mu_range,
                                 dtype=jnp.float32)
    weight_sigma = jnp.full((out_features, in_features),
                            std_init / (in_features ** 0.5), jnp.float32)
    bias_sigma = jnp.full((out_features,),
                          std_init / (out_features ** 0.5), jnp.float32)

    eps_in = _scale_noise(k_ein, in_features)     # factorized noise
    eps_out = _scale_noise(k_eout, out_features)  # weight_eps = eps_out ⊗ eps_in
    return weight_mu, weight_sigma, bias_mu, bias_sigma, eps_in, eps_out


if __name__ == "__main__":
    key = jax.random.PRNGKey(0)
    k_params, k_x = jax.random.split(key)

    B, IN_F, OUT_F = 8, 32, 16
    MIN_SIGMA, STD_INIT = 1e-3, 0.5

    (weight_mu, weight_sigma, bias_mu, bias_sigma,
     eps_in, eps_out) = make_noisy_linear_params(k_params, IN_F, OUT_F, STD_INIT)
    x = jax.random.normal(k_x, (B, IN_F), dtype=jnp.float32)

    # --- training mode ---
    out = jax.block_until_ready(noisy_linear_forward(
        x, weight_mu, weight_sigma, bias_mu, bias_sigma, eps_in, eps_out,
        min_sigma=MIN_SIGMA, training=True))

    w_eps_ref = jnp.outer(eps_out, eps_in)
    w_ref = weight_mu + jnp.maximum(weight_sigma, MIN_SIGMA) * w_eps_ref
    b_ref = bias_mu + jnp.maximum(bias_sigma, MIN_SIGMA) * eps_out
    ref = x @ w_ref.T + b_ref
    assert out.shape == (B, OUT_F)
    assert jnp.allclose(out, ref, atol=1e-5, rtol=1e-5), "train-mode mismatch"

    # --- eval mode (mu-only fast path) ---
    out_eval = jax.block_until_ready(noisy_linear_forward(
        x, weight_mu, weight_sigma, bias_mu, bias_sigma, eps_in, eps_out,
        min_sigma=MIN_SIGMA, training=False))
    ref_eval = x @ weight_mu.T + bias_mu
    assert jnp.allclose(out_eval, ref_eval, atol=1e-5, rtol=1e-5), "eval mismatch"

    # --- bf16 matmul-operand path (v6e/v7x MXU), f32 accumulation ---
    out_bf16 = jax.block_until_ready(noisy_linear_forward(
        x, weight_mu, weight_sigma, bias_mu, bias_sigma, eps_in, eps_out,
        min_sigma=MIN_SIGMA, training=True, compute_dtype=jnp.bfloat16))
    assert jnp.allclose(out_bf16, ref, atol=1e-1, rtol=1e-2), "bf16 mismatch"

    print("KERNEL_OK")
</pallas_src>

<mosaic_0001>
module attributes {stable_mosaic.version = 11 : i64} {
  func.func @_noisy_linear_train_kernel(%arg0: i32, %arg1: i32, %arg2: i32, %arg3: memref<8x128xf32, #tpu.memory_space<vmem>>, %arg4: memref<128x128xf32, #tpu.memory_space<vmem>>, %arg5: memref<128x128xf32, #tpu.memory_space<vmem>>, %arg6: memref<128x1xf32, #tpu.memory_space<vmem>>, %arg7: memref<1x128xf32, #tpu.memory_space<vmem>>, %arg8: memref<1x128xf32, #tpu.memory_space<vmem>>, %arg9: memref<1x128xf32, #tpu.memory_space<vmem>>, %arg10: memref<1x128xf32, #tpu.memory_space<vmem>>, %arg11: memref<8x128xf32, #tpu.memory_space<vmem>>, %arg12: memref<8x128xf32, #tpu.memory_space<vmem>>) attributes {dimension_semantics = [#tpu.dimension_semantics<parallel>, #tpu.dimension_semantics<parallel>, #tpu.dimension_semantics<arbitrary>], iteration_bounds = array<i64: 1, 1, 1>, scalar_prefetch = 0 : i64, scratch_operands = 1 : i64, tpu.core_type = #tpu.core_type<tc>, window_params = [{transform_indices = @transform_0, window_bounds = array<i64: 8, 128>}, {transform_indices = @transform_1, window_bounds = array<i64: 128, 128>}, {transform_indices = @transform_2, window_bounds = array<i64: 128, 128>}, {transform_indices = @transform_3, window_bounds = array<i64: 128, 1>}, {transform_indices = @transform_4, window_bounds = array<i64: 1, 128>}, {transform_indices = @transform_5, window_bounds = array<i64: 1, 128>}, {transform_indices = @transform_6, window_bounds = array<i64: 1, 128>}, {transform_indices = @transform_7, window_bounds = array<i64: 1, 128>}, {transform_indices = @transform_8, window_bounds = array<i64: 8, 128>}]} {
    %c0_i32 = arith.constant 0 : i32
    %0 = arith.cmpi eq, %arg2, %c0_i32 : i32
    %1 = arith.extui %0 : i1 to i32
    %c0_i32_0 = arith.constant 0 : i32
    %2 = arith.cmpi ne, %1, %c0_i32_0 : i32
    scf.if %2 {
      %cst_17 = arith.constant 0.000000e+00 : f32
      %22 = vector.broadcast %cst_17 : f32 to vector<8x128xf32>
      %c0_18 = arith.constant 0 : index
      %c0_19 = arith.constant 0 : index
      %23 = vector.load %arg12[%c0_18, %c0_19] : memref<8x128xf32, #tpu.memory_space<vmem>>, vector<8x128xf32>
      tpu.vector_store %arg12[%c0_18, %c0_19], %22 {strides = array<i32>} : memref<8x128xf32, #tpu.memory_space<vmem>>, vector<8x128xf32>,
    } else {
    }
    %c0 = arith.constant 0 : index
    %c0_1 = arith.constant 0 : index
    %3 = vector.load %arg5[%c0, %c0_1] : memref<128x128xf32, #tpu.memory_space<vmem>>, vector<128x128xf32>
    %cst = arith.constant 1.000000e-03 : f32
    %4 = vector.broadcast %cst : f32 to vector<128x128xf32>
    %5 = arith.maximumf %3, %4 : vector<128x128xf32>
    %c0_2 = arith.constant 0 : index
    %c0_3 = arith.constant 0 : index
    %6 = vector.load %arg6[%c0_2, %c0_3] : memref<128x1xf32, #tpu.memory_space<vmem>>, vector<128x1xf32>
    %c0_4 = arith.constant 0 : index
    %c0_5 = arith.constant 0 : index
    %7 = vector.load %arg7[%c0_4, %c0_5] : memref<1x128xf32, #tpu.memory_space<vmem>>, vector<1x128xf32>
    %8 = vector.broadcast %6 : vector<128x1xf32> to vector<128x128xf32>
    %9 = vector.broadcast %7 : vector<1x128xf32> to vector<128x128xf32>
    %10 = arith.mulf %8, %9 : vector<128x128xf32>
    %c0_6 = arith.constant 0 : index
    %c0_7 = arith.constant 0 : index
    %11 = vector.load %arg4[%c0_6, %c0_7] : memref<128x128xf32, #tpu.memory_space<vmem>>, vector<128x128xf32>
    %12 = arith.mulf %5, %10 : vector<128x128xf32>
    %13 = arith.addf %11, %12 : vector<128x128xf32>
    %c0_8 = arith.constant 0 : index
    %c0_9 = arith.constant 0 : index
    %14 = vector.load %arg12[%c0_8, %c0_9] : memref<8x128xf32, #tpu.memory_space<vmem>>, vector<8x128xf32>
    %c0_10 = arith.constant 0 : index
    %c0_11 = arith.constant 0 : index
    %15 = vector.load %arg3[%c0_10, %c0_11] : memref<8x128xf32, #tpu.memory_space<vmem>>, vector<8x128xf32>
    %cst_12 = arith.constant dense<0.000000e+00> : vector<8x128xf32>
    %16 = tpu.matmul %15, %13, %cst_12 {dimension_numbers = #tpu.dot_dimension_numbers<[1], [1], [0], [0], [0, 0, 1, 0], [], []>} : vector<8x128xf32>, vector<128x128xf32>, vector<8x128xf32> -> vector<8x128xf32>
    %17 = arith.addf %14, %16 : vector<8x128xf32>
    %c0_13 = arith.constant 0 : index
    %c0_14 = arith.constant 0 : index
    %18 = vector.load %arg12[%c0_13, %c0_14] : memref<8x128xf32, #tpu.memory_space<vmem>>, vector<8x128xf32>
    tpu.vector_store %arg12[%c0_13, %c0_14], %17 {strides = array<i32>} : memref<8x128xf32, #tpu.memory_space<vmem>>, vector<8x128xf32>,
    %c0_i32_15 = arith.constant 0 : i32
    %19 = arith.cmpi eq, %arg2, %c0_i32_15 : i32
    %20 = arith.extui %19 : i1 to i32
    %c0_i32_16 = arith.constant 0 : i32
    %21 = arith.cmpi ne, %20, %c0_i32_16 : i32
    scf.if %21 {
      %c0_17 = arith.constant 0 : index
      %c0_18 = arith.constant 0 : index
      %22 = vector.load %arg9[%c0_17, %c0_18] : memref<1x128xf32, #tpu.memory_space<vmem>>, vector<1x128xf32>
      %cst_19 = arith.constant 1.000000e-03 : f32
      %23 = vector.broadcast %cst_19 : f32 to vector<1x128xf32>
      %24 = arith.maximumf %22, %23 : vector<1x128xf32>
      %c0_20 = arith.constant 0 : index
      %c0_21 = arith.constant 0 : index
      %25 = vector.load %arg8[%c0_20, %c0_21] : memref<1x128xf32, #tpu.memory_space<vmem>>, vector<1x128xf32>
      %c0_22 = arith.constant 0 : index
      %c0_23 = arith.constant 0 : index
      %26 = vector.load %arg10[%c0_22, %c0_23] : memref<1x128xf32, #tpu.memory_space<vmem>>, vector<1x128xf32>
      %27 = arith.mulf %24, %26 : vector<1x128xf32>
      %28 = arith.addf %25, %27 : vector<1x128xf32>
      %c0_24 = arith.constant 0 : index
      %c0_25 = arith.constant 0 : index
      %29 = vector.load %arg12[%c0_24, %c0_25] : memref<8x128xf32, #tpu.memory_space<vmem>>, vector<8x128xf32>
      %30 = vector.broadcast %28 : vector<1x128xf32> to vector<8x128xf32>
      %31 = arith.addf %29, %30 : vector<8x128xf32>
      %c0_26 = arith.constant 0 : index
      %c0_27 = arith.constant 0 : index
      %32 = vector.load %arg11[%c0_26, %c0_27] : memref<8x128xf32, #tpu.memory_space<vmem>>, vector<8x128xf32>
      tpu.vector_store %arg11[%c0_26, %c0_27], %31 {strides = array<i32>} : memref<8x128xf32, #tpu.memory_space<vmem>>, vector<8x128xf32>,
    } else {
    }
    return
  }
  func.func @transform_0(%arg0: i32, %arg1: i32, %arg2: i32) -> (i32, i32) {
    %c0_i32 = arith.constant 0 : i32
    return %arg0, %arg2 : i32, i32
  }
  func.func @transform_1(%arg0: i32, %arg1: i32, %arg2: i32) -> (i32, i32) {
    %c0_i32 = arith.constant 0 : i32
    return %arg1, %arg2 : i32, i32
  }
  func.func @transform_2(%arg0: i32, %arg1: i32, %arg2: i32) -> (i32, i32) {
    %c0_i32 = arith.constant 0 : i32
    return %arg1, %arg2 : i32, i32
  }
  func.func @transform_3(%arg0: i32, %arg1: i32, %arg2: i32) -> (i32, i32) {
    %c0_i32 = arith.constant 0 : i32
    %c0_i32_0 = arith.constant 0 : i32
    return %arg1, %c0_i32 : i32, i32
  }
  func.func @transform_4(%arg0: i32, %arg1: i32, %arg2: i32) -> (i32, i32) {
    %c0_i32 = arith.constant 0 : i32
    %c0_i32_0 = arith.constant 0 : i32
    return %c0_i32, %arg2 : i32, i32
  }
  func.func @transform_5(%arg0: i32, %arg1: i32, %arg2: i32) -> (i32, i32) {
    %c0_i32 = arith.constant 0 : i32
    %c0_i32_0 = arith.constant 0 : i32
    return %c0_i32, %arg1 : i32, i32
  }
  func.func @transform_6(%arg0: i32, %arg1: i32, %arg2: i32) -> (i32, i32) {
    %c0_i32 = arith.constant 0 : i32
    %c0_i32_0 = arith.constant 0 : i32
    return %c0_i32, %arg1 : i32, i32
  }
  func.func @transform_7(%arg0: i32, %arg1: i32, %arg2: i32) -> (i32, i32) {
    %c0_i32 = arith.constant 0 : i32
    %c0_i32_0 = arith.constant 0 : i32
    return %c0_i32, %arg1 : i32, i32
  }
  func.func @transform_8(%arg0: i32, %arg1: i32, %arg2: i32) -> (i32, i32) {
    %c0_i32 = arith.constant 0 : i32
    return %arg0, %arg1 : i32, i32
  }
}

</mosaic_0001>

<bundles_post_ra>
// kernel: tpu_custom_call.1
= control target key start
LH: loop header
LB: loop body
LE: loop exit
PB: predicated region body
PF: predicated region fallthrough
CT: control target
= control target key end

     0   :  { %13 = vsyncpa [#allocation4], 0  ;;  %s592_s0 = inlined_call_operand.hbm [shape: f32[8,128], index: 0, kind: input, shape index: {}]   ;;  %s593_s1 = inlined_call_operand.vmem [shape: f32[128,128], index: 1, kind: input, shape index: {}]   ;;  %s594_s2 = inlined_call_operand.hbm [shape: f32[128,128], index: 2, kind: input, shape index: {}]   ;;  %s595_s3 = inlined_call_operand.vmem [shape: f32[128,1], index: 3, kind: input, shape index: {}]   ;;  %s596_s4 = inlined_call_operand.vmem [shape: f32[1,128], index: 4, kind: input, shape index: {}]   ;;  %s597_s5 = inlined_call_operand.vmem [shape: f32[1,128], index: 5, kind: input, shape index: {}]   ;;  %s598_s6 = inlined_call_operand.vmem [shape: f32[1,128], index: 6, kind: input, shape index: {}]   ;;  %s599_s7 = inlined_call_operand.vmem [shape: f32[1,128], index: 7, kind: input, shape index: {}]   ;;  %s600_s8 = inlined_call_operand.hbm [shape: f32[8,128], index: 8, kind: output, shape index: {}]  }
   0x1   :  { %14 = vsyncpa [#allocation7], 0 }
   0x2   :  { %15 = vsyncpa [#allocation5], 0  ;;  %s21_s29 = sshll.u32 %s592_s0, 4  ;;  %s406_s30 = smov [#allocation3]   ;;  %s22_s29 = int_to_ptr.hbm [resolvable:$true] %s21_s29 }
   0x3   :  { %s23_s9 = sshll.u32 %s406_s30, 4  ;;  %s33_s12 = sshll.u32 %s594_s2, 4  ;;  %s24_s9 = int_to_ptr.vmem [resolvable:$true] %s23_s9  ;;  %s34_s12 = int_to_ptr.hbm [resolvable:$true] %s33_s12 }
   0x4   :  { %26 = dma.hbm_to_vmem [thread:$0]  %s22_s29, 128, %s24_s9, [#allocation4]  }
   0x5   :  { %s407_s13 = smov [#allocation6]   ;;  %s408_s15 = smov 128  }
   0x6   :  { %s35_s14 = sshll.u32 %s407_s13, 4  ;;  %s409_s16 = smov 8   ;;  %s36_s14 = int_to_ptr.vmem [resolvable:$true] %s35_s14 }
   0x7   :  { %41 = dma.hbm_to_vmem [thread:$0]  %s34_s12, 2048, %s36_s14, [#allocation7], %s408_s15, %s408_s15, %s409_s16  }
   0x8   :  { %400 = dma.done.wait [#allocation4], 128  }
   0x9   :  { %401 = vsyncadd [#allocation4], 4294967168 }
   0xa   :  { %402 = dma.done.wait [#allocation7], 2048  }
   0xb   :  { %403 = vsyncadd [#allocation7], 4294965248  ;;  %v410_v0 = vmov 0   ;;  %v112_v1 = vld [vmem:[%s595_s3 + $0x78] sm:$0xff]  ;;  %v110_v2 = vld [vmem:[%s595_s3 + $0x68] sm:$0xff]  ;;  %s307_s16 = sshll.u32 %s600_s8, 4  ;;  %s308_s16 = int_to_ptr.hbm [resolvable:$true] %s307_s16 }
   0xc   :  { %325 = vset.pattern.permute.xlu1 %v410_v0  ;;  %324 = vset.pattern.permute.xlu0 %v410_v0  ;;  %v108_v3 = vld [vmem:[%s595_s3 + $0x58] sm:$0xff]  ;;  %v111_v4 = vld [vmem:[%s595_s3 + $0x70] sm:$0xff]  ;;  %v109_v5 = vld [vmem:[%s595_s3 + $0x60] sm:$0xff] }
   0xd   :  { %326 = vset.pattern.permute.xlu2 %v410_v0  ;;  %191 = vperm.xlu0 %324, %v112_v1   ;;  %v107_v6 = vld [vmem:[%s595_s3 + $0x50] sm:$0xff]  ;;  %v106_v7 = vld [vmem:[%s595_s3 + $0x48] sm:$0xff]  ;;  %v105_v8 = vld [vmem:[%s595_s3 + $0x40] sm:$0xff] }
   0xe   :  { %181 = vperm.xlu1 %325, %v110_v2   ;;  %171 = vperm.xlu2 %326, %v108_v3   ;;  %v104_v9 = vld [vmem:[%s595_s3 + $0x38] sm:$0xff]  ;;  %v103_v10 = vld [vmem:[%s595_s3 + $0x30] sm:$0xff]  ;;  %v102_v11 = vld [vmem:[%s595_s3 + $0x28] sm:$0xff] }
   0xf   :  { %v101_v12 = vld [vmem:[%s595_s3 + $0x20] sm:$0xff]  ;;  %v100_v13 = vld [vmem:[%s595_s3 + $0x18] sm:$0xff]  ;;  %v99_v14 = vld [vmem:[%s595_s3 + $0x10] sm:$0xff] }
  0x10   :  { %v98_v15 = vld [vmem:[%s595_s3 + $0x8] sm:$0xff]  ;;  %v97_v16 = vld [vmem:[%s595_s3] sm:$0xff]  ;;  %v228_v23 = vld [vmem:[%s593_s1 + $0x78] sm:$0xff] }
  0x11   :  { %v80_v17 = vld [vmem:[#allocation6 + $0x78] sm:$0xff]  ;;  %v79_v25 = vld [vmem:[#allocation6 + $0x70] sm:$0xff]  ;;  %v78_v27 = vld [vmem:[#allocation6 + $0x68] sm:$0xff] }
  0x12   :  { %v514_v18 = vld [vmem:[%s596_s4] ss:$0 sm:$0xff]  ;;  %v96_v19 = vmax.f32 %v80_v17, 0.001  ;;  %v95_v28 = vmax.f32 %v79_v25, 0.001 }
  0x13   :  { %v94_v30 = vmax.f32 %v78_v27, 0.001  ;;  %v77_v35 = vld [vmem:[#allocation6 + $0x60] sm:$0xff]  ;;  %v227_v36 = vld [vmem:[%s593_s1 + $0x70] sm:$0xff]  ;;  %v76_v42 = vld [vmem:[#allocation6 + $0x58] sm:$0xff] }
  0x14   :  { %v93_v39 = vmax.f32 %v77_v35, 0.001  ;;  %v226_v43 = vld [vmem:[%s593_s1 + $0x68] sm:$0xff]  ;;  %v92_v44 = vmax.f32 %v76_v42, 0.001  ;;  %v75_v48 = vld [vmem:[#allocation6 + $0x50] sm:$0xff] }
  0x15   :  { %186 = vperm.xlu0 %324, %v111_v4   ;;  %v225_v49 = vld [vmem:[%s593_s1 + $0x60] sm:$0xff]  ;;  %v91_v52 = vmax.f32 %v75_v48, 0.001  ;;  %v74_v56 = vld [vmem:[#allocation6 + $0x48] sm:$0xff]  ;;  %v224_v57 = vld [vmem:[%s593_s1 + $0x58] sm:$0xff] }
  0x16   :  { %176 = vperm.xlu1 %325, %v109_v5   ;;  %166 = vperm.xlu2 %326, %v107_v6   ;;  %v90_v59 = vmax.f32 %v74_v56, 0.001  ;;  %v73_v63 = vld [vmem:[#allocation6 + $0x40] sm:$0xff]  ;;  %v223_v0 = vld [vmem:[%s593_s1 + $0x50] sm:$0xff]  ;;  %v72_v5 = vld [vmem:[#allocation6 + $0x38] sm:$0xff] }
  0x17   :  { %v89_v2 = vmax.f32 %v73_v63, 0.001  ;;  %v222_v6 = vld [vmem:[%s593_s1 + $0x48] sm:$0xff]  ;;  %v68_v35 = vld [vmem:[#allocation6 + $0x18] sm:$0xff]  ;;  %v67_v42 = vld [vmem:[#allocation6 + $0x10] sm:$0xff] }
  0x18   :  { %v69_v27 = vld [vmem:[#allocation6 + $0x20] sm:$0xff] }
  0x19   :  { %v65_v56 = vld [vmem:[#allocation6] sm:$0xff] }
  0x1d   :  { %161 = vperm.xlu0 %324, %v106_v7  }
  0x1e   :  { %156 = vperm.xlu1 %325, %v105_v8   ;;  %151 = vperm.xlu2 %326, %v104_v9   ;;  %v88_v8 = vmax.f32 %v72_v5, 0.001  ;;  %v291_v5 = vld [vmem:[%s599_s7] sm:$0x1] }
  0x25   :  { %146 = vperm.xlu0 %324, %v103_v10  }
  0x26   :  { %141 = vperm.xlu1 %325, %v102_v11   ;;  %136 = vperm.xlu2 %326, %v101_v12  }
  0x2d   :  { %131 = vperm.xlu0 %324, %v100_v13   ;;  %v71_v13 = vld [vmem:[#allocation6 + $0x30] sm:$0xff] }
  0x2e   :  { %126 = vperm.xlu1 %325, %v99_v14   ;;  %121 = vperm.xlu2 %326, %v98_v15   ;;  %v221_v14 = vld [vmem:[%s593_s1 + $0x40] sm:$0xff] }
  0x35   :  { %116 = vperm.xlu0 %324, %v97_v16   ;;  %v87_v16 = vmax.f32 %v71_v13, 0.001 }
  0x68   :  { %v172_v33 = vpop.permute.xlu2 %171 }
  0x69   :  { %v208_v45 = vmul.f32 %v514_v18, %v172_v33 }
  0x6b   :  { %v240_v51 = vmul.f32 %v208_v45, %v92_v44  ;;  %v83_v45 = vmax.f32 %v67_v42, 0.001 }
  0x6d   :  { %v256_v61 = vadd.f32 %v240_v51, %v224_v57  ;;  %v215_v57 = vld [vmem:[%s593_s1 + $0x10] sm:$0xff] }
  0x70   :  { %v167_v50 = vpop.permute.xlu2 %166 }
  0x71   :  { %v207_v53 = vmul.f32 %v514_v18, %v167_v50  ;;  %v216_v50 = vld [vmem:[%s593_s1 + $0x18] sm:$0xff] }
  0x73   :  { %v239_v58 = vmul.f32 %v207_v53, %v91_v52 }
  0x75   :  { %v255_v4 = vadd.f32 %v239_v58, %v223_v0 }
  0x78   :  { %v152_v7 = vpop.permute.xlu2 %151 }
  0x79   :  { %v204_v9 = vmul.f32 %v514_v18, %v152_v7  ;;  %v290_v7 = vld [vmem:[%s597_s5] sm:$0x1] }
  0x7b   :  { %v236_v15 = vmul.f32 %v204_v9, %v88_v8 }
  0x7f   :  { %v192_v20 = vpop.permute.xlu0 %191 }
  0x80   :  { %v182_v21 = vpop.permute.xlu1 %181  ;;  %v212_v22 = vmul.f32 %v514_v18, %v192_v20 }
  0x81   :  { %v210_v31 = vmul.f32 %v514_v18, %v182_v21  ;;  %v70_v21 = vld [vmem:[#allocation6 + $0x28] sm:$0xff] }
  0x82   :  { %v244_v24 = vmul.f32 %v212_v22, %v96_v19  ;;  %v220_v22 = vld [vmem:[%s593_s1 + $0x38] sm:$0xff] }
  0x83   :  { %v242_v38 = vmul.f32 %v210_v31, %v94_v30  ;;  %v85_v30 = vmax.f32 %v69_v27, 0.001 }
  0x84   :  { %v260_v26 = vadd.f32 %v244_v24, %v228_v23  ;;  %v86_v24 = vmax.f32 %v70_v21, 0.001 }
  0x85   :  { %v258_v47 = vadd.f32 %v242_v38, %v226_v43  ;;  %v84_v38 = vmax.f32 %v68_v35, 0.001  ;;  %v217_v43 = vld [vmem:[%s593_s1 + $0x20] sm:$0xff] }
  0x86   :  { %263 = vmatpush.xpose.msra.mxu0 %v260_v26  ;;  %v252_v26 = vadd.f32 %v236_v15, %v220_v22 }
  0x87   :  { %v187_v29 = vpop.permute.xlu0 %186 }
  0x88   :  { %v211_v32 = vmul.f32 %v514_v18, %v187_v29  ;;  %v177_v34 = vpop.permute.xlu1 %176  ;;  %v137_v29 = vpop.permute.xlu2 %136 }
  0x89   :  { %v209_v40 = vmul.f32 %v514_v18, %v177_v34  ;;  %v201_v31 = vmul.f32 %v514_v18, %v137_v29 }
  0x8a   :  { %v243_v37 = vmul.f32 %v211_v32, %v95_v28  ;;  %v219_v28 = vld [vmem:[%s593_s1 + $0x30] sm:$0xff] }
  0x8b   :  { %v241_v46 = vmul.f32 %v209_v40, %v93_v39 }
  0x8c   :  { %v259_v41 = vadd.f32 %v243_v37, %v227_v36  ;;  %v218_v36 = vld [vmem:[%s593_s1 + $0x28] sm:$0xff]  ;;  %v233_v37 = vmul.f32 %v201_v31, %v85_v30 }
  0x8d   :  { %v257_v54 = vadd.f32 %v241_v46, %v225_v49  ;;  %v66_v49 = vld [vmem:[#allocation6 + $0x8] sm:$0xff] }
  0x8e   :  { %264 = vmatpush.xpose.msra.mxu0 %v259_v41  ;;  %v82_v51 = vmax.f32 %v66_v49, 0.001 }
  0x8f   :  { %v162_v55 = vpop.permute.xlu0 %161 }
  0x90   :  { %v206_v60 = vmul.f32 %v514_v18, %v162_v55  ;;  %v157_v62 = vpop.permute.xlu1 %156  ;;  %v122_v48 = vpop.permute.xlu2 %121 }
  0x91   :  { %v205_v3 = vmul.f32 %v514_v18, %v157_v62  ;;  %v198_v52 = vmul.f32 %v514_v18, %v122_v48  ;;  %v214_v62 = vld [vmem:[%s593_s1 + $0x8] sm:$0xff] }
  0x92   :  { %265 = vmatpush.xpose.msra.mxu0 %v258_v47  ;;  %v238_v1 = vmul.f32 %v206_v60, %v90_v59  ;;  %v249_v47 = vadd.f32 %v233_v37, %v217_v43  ;;  %v81_v59 = vmax.f32 %v65_v56, 0.001 }
  0x93   :  { %v237_v10 = vmul.f32 %v205_v3, %v89_v2  ;;  %v230_v58 = vmul.f32 %v198_v52, %v82_v51  ;;  %v262_v3 = vld [vmem:[#allocation3] sm:$0xff] }
  0x94   :  { %v254_v11 = vadd.f32 %v238_v1, %v222_v6  ;;  %v213_v1 = vld [vmem:[%s593_s1] sm:$0xff]  ;;  %s411_s1 = smov [#allocation8]  }
  0x95   :  { %v253_v19 = vadd.f32 %v237_v10, %v221_v14  ;;  %v246_v0 = vadd.f32 %v230_v58, %v214_v62  ;;  %s305_s13 = sshll.u32 %s411_s1, 4  ;;  %s306_s13 = int_to_ptr.vmem [resolvable:$true] %s305_s13 }
  0x96   :  { %266 = vmatpush.xpose.msra.mxu0 %v257_v54 }
  0x97   :  { %v147_v12 = vpop.permute.xlu0 %146 }
  0x98   :  { %v203_v17 = vmul.f32 %v514_v18, %v147_v12  ;;  %v142_v20 = vpop.permute.xlu1 %141 }
  0x99   :  { %v202_v25 = vmul.f32 %v514_v18, %v142_v20 }
  0x9a   :  { %267 = vmatpush.xpose.msra.mxu0 %v256_v61  ;;  %v235_v23 = vmul.f32 %v203_v17, %v87_v16 }
  0x9b   :  { %v234_v32 = vmul.f32 %v202_v25, %v86_v24 }
  0x9c   :  { %v251_v33 = vadd.f32 %v235_v23, %v219_v28 }
  0x9d   :  { %v250_v40 = vadd.f32 %v234_v32, %v218_v36 }
  0x9e   :  { %268 = vmatpush.xpose.msra.mxu0 %v255_v4 }
  0x9f   :  { %v132_v34 = vpop.permute.xlu0 %131 }
  0xa0   :  { %v200_v39 = vmul.f32 %v514_v18, %v132_v34  ;;  %v127_v41 = vpop.permute.xlu1 %126 }
  0xa1   :  { %v199_v46 = vmul.f32 %v514_v18, %v127_v41 }
  0xa2   :  { %269 = vmatpush.xpose.msra.mxu0 %v254_v11  ;;  %v232_v44 = vmul.f32 %v200_v39, %v84_v38 }
  0xa3   :  { %v231_v53 = vmul.f32 %v199_v46, %v83_v45 }
  0xa4   :  { %v248_v54 = vadd.f32 %v232_v44, %v216_v50 }
  0xa5   :  { %v247_v61 = vadd.f32 %v231_v53, %v215_v57 }
  0xa6   :  { %270 = vmatpush.xpose.msra.mxu0 %v253_v19 }
  0xa7   :  { %v117_v55 = vpop.permute.xlu0 %116 }
  0xa8   :  { %v197_v60 = vmul.f32 %v514_v18, %v117_v55  ;;  %v288_v18 = vld [vmem:[%s598_s6] sm:$0x1] }
  0xa9   :  { %v289_v4 = vmax.f32 %v288_v18, 0.001 }
  0xaa   :  { %271 = vmatpush.xpose.msra.mxu0 %v252_v26  ;;  %v229_v63 = vmul.f32 %v197_v60, %v81_v59 }
  0xab   :  { %v292_v6 = vmul.f32 %v291_v5, %v289_v4 }
  0xac   :  { %v245_v2 = vadd.f32 %v229_v63, %v213_v1 }
  0xad   :  { %v293_v8 = vadd.f32 %v292_v6, %v290_v7 }
  0xae   :  { %272 = vmatpush.xpose.msra.mxu0 %v251_v33 }
  0xaf   :  { %v296_v9 = vperm.slane %v293_v8, 0 }
  0xb2   :  { %273 = vmatpush.xpose.msra.mxu0 %v250_v40 }
  0xb6   :  { %274 = vmatpush.xpose.msra.mxu0 %v249_v47 }
  0xba   :  { %275 = vmatpush.xpose.msra.mxu0 %v248_v54 }
  0xbe   :  { %276 = vmatpush.xpose.msra.mxu0 %v247_v61 }
  0xc2   :  { %277 = vmatpush.xpose.msra.mxu0 %v246_v0 }
  0xc6   :  { %278 = vmatpush.xpose.msra.mxu0 %v245_v2 }
  0xc9   :  { %279 = vmatmul.f32.vlgmr.msra.gmra.mxu0 %v262_v3 }
 0x146   :  { %v280_v10 = vpop.f32.mrf.mxu0 }
 0x147   :  { %v298_v11 = vadd.f32 %v296_v9, %v280_v10 }
 0x149   :  { %299 = vst [vmem:[#allocation8] sm:$0xff] %v298_v11 }
 0x14a   :  { %310 = dma.vmem_to_hbm [thread:$0]  %s306_s13, 128, %s308_s16, [#allocation5]  }
 0x14b   :  { %404 = dma.done.wait [#allocation5], 128  }
 0x14c   :  { %405 = vsyncadd [#allocation5], 4294967168 }
 0x14d   :  { %315 = vsyncpa [#allocation4], 1 }
 0x14e   :  { %316 = vsyncpa [#allocation7], 1 }
 0x14f   :  { %317 = vsyncpa [#allocation5], 1 }

</bundles_post_ra>
